<compile_context>
chip_gen: v6e
topology: v6e:2x2x1
jax: 0.10.0
libtpu: 0.0.40
codegen_flags: <defaults>
</compile_context>

<pallas_src>
import functools

import jax
import jax.numpy as jnp
from jax import lax
from jax.experimental import pallas as pl
from jax.experimental.pallas import tpu as pltpu

LANES = 128
CHUNK_ROWS = 256                 # inner-chunk rows (multiple of 32: any dtype ok)
MAX_R_BLK = 8192                 # rows per grid block (8192*128*4B = 4 MiB f32)
VMEM_LIMIT = 48 * 1024 * 1024    # explicit scoped-VMEM cap (safe on v5e/v6e/v7x)


def _sublane_multiple(dtype):
    sz = jnp.dtype(dtype).itemsize
    if sz >= 4:
        return 8
    if sz == 2:
        return 16
    return 32


def _loss_sums_kernel(x_ref, y_ref, d_ref, o_ref, *, focal_gamma, r_blk, chunk,
                      nb_inner, num_blocks, guard, use_mxu):
    """Accumulates per-lane partial sums of 5 global reductions into o_ref.

    o_ref is a (40, 128) f32 block (one per parallel core), five stacked
    (8, 128) slabs:
      rows  0.. 7: sum(sigmoid(x) * y)          (dice intersect)
      rows  8..15: sum(sigmoid(x))              (dice denom, pred part)
      rows 16..23: sum(y)                       (dice denom, label part)
      rows 24..31: sum(sigmoid(x) * dmap)       (surface loss numerator)
      rows 32..39: sum(bce(x,y) * (1-p_t)^g)    (focal loss numerator)
    """
    c = pl.program_id(0)   # parallel (core) axis
    j = pl.program_id(1)   # arbitrary (reduction) axis

    @pl.when(j == 0)
    def _():
        o_ref[...] = jnp.zeros_like(o_ref)

    if use_mxu:
        # Fold matrix M[s, r] = (r % 8 == s): dot(M, q) == reshape-sum over
        # every 8th row, but runs on the (idle) MXU instead of the VPU.
        rows_i = lax.broadcasted_iota(jnp.int32, (8, chunk), 0)
        cols_i = lax.broadcasted_iota(jnp.int32, (8, chunk), 1)
        fold = (cols_i % 8 == rows_i).astype(jnp.float32)

        def red(q):
            return jnp.dot(fold, q, preferred_element_type=jnp.float32)
    else:
        def red(q):
            return jnp.sum(q.reshape(chunk // 8, 8, LANES), axis=0)

    g = float(focal_gamma)
    gr = int(round(g))
    int_gamma = abs(g - gr) < 1e-6 and 1 <= gr <= 4

    def chunk_body(ci, carry):
        a_py, a_p, a_y, a_pd, a_fe = carry
        start = pl.multiple_of(ci * chunk, chunk)
        x = x_ref[pl.ds(start, chunk), :].astype(jnp.float32)
        y = y_ref[pl.ds(start, chunk), :].astype(jnp.float32)
        d = d_ref[pl.ds(start, chunk), :].astype(jnp.float32)

        # One exp feeds both sigmoid and the stable-BCE log term.
        t = jnp.exp(-jnp.abs(x))                          # EUP exp
        inv_1pt = pl.reciprocal(1.0 + t, approx=True)     # EUP rcp (approx)
        p = jnp.where(x >= 0.0, inv_1pt, t * inv_1pt)     # == sigmoid(x)

        # Stable BCE-with-logits: max(x,0) - x*y + log1p(exp(-|x|))
        ce = jnp.maximum(x, 0.0) - x * y + jnp.log1p(t)
        py = p * y
        one_m_pt = p + y - 2.0 * py                       # == 1 - p_t
        if int_gamma:
            mod = one_m_pt
            for _ in range(gr - 1):
                mod = mod * one_m_pt                      # no pow -> no log+exp
        else:
            mod = one_m_pt ** g
        fe = ce * mod

        return (a_py + red(py), a_p + red(p), a_y + red(y),
                a_pd + red(p * d), a_fe + red(fe))

    def run():
        zero = jnp.zeros((8, LANES), jnp.float32)
        n_chunks = r_blk // chunk
        carry = lax.fori_loop(0, n_chunks, chunk_body,
                              (zero, zero, zero, zero, zero),
                              unroll=min(4, n_chunks))
        # Single accumulator RMW per grid step.
        o_ref[...] += jnp.concatenate(list(carry), axis=0)

    if guard:
        # Odd block count: last iteration of core 1 is a padded re-read; skip it.
        pl.when(c * nb_inner + j < num_blocks)(run)
    else:
        run()


def _elem_sums_jax(x, y, d, focal_gamma):
    """Plain-JAX fallback for the (< one block) unaligned tail."""
    x = x.astype(jnp.float32)
    y = y.astype(jnp.float32)
    d = d.astype(jnp.float32)
    p = jax.nn.sigmoid(x)
    ce = jnp.maximum(x, 0.0) - x * y + jnp.log1p(jnp.exp(-jnp.abs(x)))
    p_t = p * y + (1.0 - p) * (1.0 - y)
    fe = ce * (1.0 - p_t) ** focal_gamma
    return jnp.stack([jnp.sum(p * y), jnp.sum(p), jnp.sum(y),
                      jnp.sum(p * d), jnp.sum(fe)])


def hybridloss_fds(predicted_output, label, distance_map,
                   alpha=0.33, beta=0.33, gamma=0.33, focal_gamma=2.0):
    """Reproduces hybridloss_fds.forward: returns the 7-tuple of metrics.

    label / distance_map may be passed in narrower dtypes (bool/int8/bf16) to
    cut HBM traffic; the kernel casts to f32 internally.
    """
    assert predicted_output.shape == label.shape == distance_map.shape
    n = int(predicted_output.size)

    xf = jnp.ravel(predicted_output)
    yf = jnp.ravel(label)
    df = jnp.ravel(distance_map)

    mult = max(_sublane_multiple(a.dtype) for a in (xf, yf, df))
    rows_full = n // LANES

    # Block height: as large as possible up to MAX_R_BLK, in CHUNK_ROWS units
    # on the main path; small inputs still go through the kernel in one step.
    if rows_full >= CHUNK_ROWS:
        r_blk = min(MAX_R_BLK, (rows_full // CHUNK_ROWS) * CHUNK_ROWS)
        chunk = CHUNK_ROWS
    else:
        r_blk = (rows_full // mult) * mult
        chunk = r_blk

    sums = jnp.zeros((5,), jnp.float32)
    n_main = 0
    if r_blk > 0:
        block_elems = r_blk * LANES
        num_blocks = n // block_elems
        if num_blocks > 0:
            n_main = num_blocks * block_elems
            xm = xf[:n_main].reshape(-1, LANES)
            ym = yf[:n_main].reshape(-1, LANES)
            dm = df[:n_main].reshape(-1, LANES)

            # Leading "parallel" grid axis -> both TensorCores on v7x.
            n_split = 2 if num_blocks >= 2 else 1
            nb_inner = -(-num_blocks // n_split)
            guard = (n_split * nb_inner != num_blocks)
            use_mxu = chunk >= CHUNK_ROWS

            if guard:
                def in_idx(c, j):
                    return (jnp.minimum(c * nb_inner + j, num_blocks - 1), 0)
            else:
                def in_idx(c, j):
                    return (c * nb_inner + j, 0)

            kern = functools.partial(
                _loss_sums_kernel, focal_gamma=float(focal_gamma),
                r_blk=r_blk, chunk=chunk, nb_inner=nb_inner,
                num_blocks=num_blocks, guard=guard, use_mxu=use_mxu)

            in_spec = pl.BlockSpec((r_blk, LANES), in_idx)
            out = pl.pallas_call(
                kern,
                out_shape=jax.ShapeDtypeStruct((n_split * 5 * 8, LANES),
                                               jnp.float32),
                grid_spec=pltpu.PrefetchScalarGridSpec(
                    num_scalar_prefetch=0,
                    grid=(n_split, nb_inner),
                    in_specs=[in_spec, in_spec, in_spec],
                    out_specs=pl.BlockSpec((5 * 8, LANES),
                                           lambda c, j: (c, 0)),
                ),
                compiler_params=pltpu.CompilerParams(
                    dimension_semantics=("parallel", "arbitrary"),
                    vmem_limit_bytes=VMEM_LIMIT),
            )(xm, ym, dm)
            sums = sums + jnp.sum(out.reshape(n_split, 5, 8, LANES),
                                  axis=(0, 2, 3))

    if n_main < n:  # unaligned tail (< one block): tiny plain-JAX reduction
        sums = sums + _elem_sums_jax(xf[n_main:], yf[n_main:], df[n_main:],
                                     float(focal_gamma))

    intersect, sum_p, sum_y, sum_pd, sum_focal = (
        sums[0], sums[1], sums[2], sums[3], sums[4])
    nf = jnp.float32(n)

    # dice loss (torch version returns shape (1,))
    denom = jnp.maximum(sum_p + sum_y, 1e-6)      # == denominator.clamp(min=1e-6)
    dice_score = 2.0 * (intersect / denom)
    dice_error = (1.0 - dice_score).reshape(1)

    # surface loss (scalar mean)
    surface_error = sum_pd / nf

    # focal loss (scalar mean) -- focal's `alpha=0.25` is unused in the
    # reference forward, matching the PyTorch code.
    focal_error = sum_focal / nf

    fd = (dice_error * alpha + focal_error * beta) / (alpha + beta)
    sd = (dice_error * alpha + surface_error * gamma) / (alpha + gamma)
    fs = (focal_error * beta + surface_error * gamma) / (beta + gamma)
    fds = (focal_error * beta + surface_error * gamma + dice_error * alpha) / (
        alpha + beta + gamma)

    return (dice_error, surface_error, focal_error, fd, sd, fs, fds)


if __name__ == "__main__":
    key = jax.random.PRNGKey(0)
    k1, k2, k3 = jax.random.split(key, 3)

    B, C, H, W = 2, 4, 16, 16
    predicted = jax.random.normal(k1, (B, C, H, W), dtype=jnp.float32)
    label = jax.random.bernoulli(k2, 0.3, (B, C, H, W)).astype(jnp.float32)
    # synthetic signed "distance map" values
    # TODO(synk): true euclidean distance transform (scipy distance_transform_edt)
    # is host-side preprocessing with no Pallas equivalent; the loss only
    # consumes the precomputed map, so we synthesize one here.
    dmap = jnp.round(jax.random.uniform(k3, (B, C, H, W), minval=-5.0,
                                        maxval=10.0)).astype(jnp.float32)

    metrics = hybridloss_fds(predicted, label, dmap)
    metrics = jax.block_until_ready(metrics)

    print("KERNEL_OK")
</pallas_src>

<mosaic_0001>
module attributes {stable_mosaic.version = 11 : i64} {
  func.func @_loss_sums_kernel(%arg0: i32, %arg1: i32, %arg2: memref<16x128xf32, #tpu.memory_space<vmem>>, %arg3: memref<16x128xf32, #tpu.memory_space<vmem>>, %arg4: memref<16x128xf32, #tpu.memory_space<vmem>>, %arg5: memref<40x128xf32, #tpu.memory_space<vmem>>) attributes {dimension_semantics = [#tpu.dimension_semantics<parallel>, #tpu.dimension_semantics<arbitrary>], iteration_bounds = array<i64: 1, 1>, scalar_prefetch = 0 : i64, scratch_operands = 0 : i64, tpu.core_type = #tpu.core_type<tc>, window_params = [{transform_indices = @transform_0, window_bounds = array<i64: 16, 128>}, {transform_indices = @transform_1, window_bounds = array<i64: 16, 128>}, {transform_indices = @transform_2, window_bounds = array<i64: 16, 128>}, {transform_indices = @transform_3, window_bounds = array<i64: 40, 128>}]} {
    %c0_i32 = arith.constant 0 : i32
    %0 = arith.cmpi eq, %arg1, %c0_i32 : i32
    %1 = arith.extui %0 : i1 to i32
    %c0_i32_0 = arith.constant 0 : i32
    %2 = arith.cmpi ne, %1, %c0_i32_0 : i32
    scf.if %2 {
      %cst_18 = arith.constant 0.000000e+00 : f32
      %56 = vector.broadcast %cst_18 : f32 to vector<40x128xf32>
      %c0_19 = arith.constant 0 : index
      %c0_20 = arith.constant 0 : index
      %57 = vector.load %arg5[%c0_19, %c0_20] : memref<40x128xf32, #tpu.memory_space<vmem>>, vector<40x128xf32>
      tpu.vector_store %arg5[%c0_19, %c0_20], %56 {strides = array<i32>} : memref<40x128xf32, #tpu.memory_space<vmem>>, vector<40x128xf32>,
    } else {
    }
    %cst = arith.constant 0.000000e+00 : f32
    %3 = vector.broadcast %cst : f32 to vector<8x128xf32>
    %c0_i32_1 = arith.constant 0 : i32
    %c16_i32 = arith.constant 16 : i32
    %4 = arith.muli %c0_i32_1, %c16_i32 : i32
    %5 = tpu.assume_multiple %4, 16 : i32
    %6 = arith.index_cast %5 : i32 to index
    %c0 = arith.constant 0 : index
    %7 = vector.load %arg2[%6, %c0] : memref<16x128xf32, #tpu.memory_space<vmem>>, vector<16x128xf32>
    %8 = arith.index_cast %5 : i32 to index
    %c0_2 = arith.constant 0 : index
    %9 = vector.load %arg3[%8, %c0_2] : memref<16x128xf32, #tpu.memory_space<vmem>>, vector<16x128xf32>
    %10 = arith.index_cast %5 : i32 to index
    %c0_3 = arith.constant 0 : index
    %11 = vector.load %arg4[%10, %c0_3] : memref<16x128xf32, #tpu.memory_space<vmem>>, vector<16x128xf32>
    %12 = math.absf %7 : vector<16x128xf32>
    %cst_4 = arith.constant 0.000000e+00 : f32
    %13 = vector.broadcast %cst_4 : f32 to vector<16x128xf32>
    %14 = arith.subf %13, %12 : vector<16x128xf32>
    %15 = math.exp %14 : vector<16x128xf32>
    %cst_5 = arith.constant 1.000000e+00 : f32
    %16 = vector.broadcast %cst_5 : f32 to vector<16x128xf32>
    %17 = arith.addf %16, %15 : vector<16x128xf32>
    %18 = tpu.reciprocal %17 {approx = true} : vector<16x128xf32> -> vector<16x128xf32>
    %cst_6 = arith.constant 0.000000e+00 : f32
    %19 = vector.broadcast %cst_6 : f32 to vector<16x128xf32>
    %20 = arith.cmpf oge, %7, %19 : vector<16x128xf32>
    %21 = arith.mulf %15, %18 : vector<16x128xf32>
    %22 = arith.select %20, %18, %21 : vector<16x128xi1>, vector<16x128xf32>
    %cst_7 = arith.constant 0.000000e+00 : f32
    %23 = vector.broadcast %cst_7 : f32 to vector<16x128xf32>
    %24 = arith.maximumf %7, %23 : vector<16x128xf32>
    %25 = arith.mulf %7, %9 : vector<16x128xf32>
    %26 = arith.subf %24, %25 : vector<16x128xf32>
    %27 = math.log1p %15 : vector<16x128xf32>
    %28 = arith.addf %26, %27 : vector<16x128xf32>
    %29 = arith.mulf %22, %9 : vector<16x128xf32>
    %30 = arith.addf %22, %9 : vector<16x128xf32>
    %cst_8 = arith.constant 2.000000e+00 : f32
    %31 = vector.broadcast %cst_8 : f32 to vector<16x128xf32>
    %32 = arith.mulf %31, %29 : vector<16x128xf32>
    %33 = arith.subf %30, %32 : vector<16x128xf32>
    %34 = arith.mulf %33, %33 : vector<16x128xf32>
    %35 = arith.mulf %28, %34 : vector<16x128xf32>
    %36 = vector.shape_cast %29 : vector<16x128xf32> to vector<2x8x128xf32>
    %cst_9 = arith.constant dense<0.000000e+00> : vector<8x128xf32>
    %37 = vector.multi_reduction <add>, %36, %cst_9 [0] : vector<2x8x128xf32> to vector<8x128xf32>
    %38 = arith.addf %3, %37 : vector<8x128xf32>
    %39 = vector.shape_cast %22 : vector<16x128xf32> to vector<2x8x128xf32>
    %cst_10 = arith.constant dense<0.000000e+00> : vector<8x128xf32>
    %40 = vector.multi_reduction <add>, %39, %cst_10 [0] : vector<2x8x128xf32> to vector<8x128xf32>
    %41 = arith.addf %3, %40 : vector<8x128xf32>
    %42 = vector.shape_cast %9 : vector<16x128xf32> to vector<2x8x128xf32>
    %cst_11 = arith.constant dense<0.000000e+00> : vector<8x128xf32>
    %43 = vector.multi_reduction <add>, %42, %cst_11 [0] : vector<2x8x128xf32> to vector<8x128xf32>
    %44 = arith.addf %3, %43 : vector<8x128xf32>
    %45 = arith.mulf %22, %11 : vector<16x128xf32>
    %46 = vector.shape_cast %45 : vector<16x128xf32> to vector<2x8x128xf32>
    %cst_12 = arith.constant dense<0.000000e+00> : vector<8x128xf32>
    %47 = vector.multi_reduction <add>, %46, %cst_12 [0] : vector<2x8x128xf32> to vector<8x128xf32>
    %48 = arith.addf %3, %47 : vector<8x128xf32>
    %49 = vector.shape_cast %35 : vector<16x128xf32> to vector<2x8x128xf32>
    %cst_13 = arith.constant dense<0.000000e+00> : vector<8x128xf32>
    %50 = vector.multi_reduction <add>, %49, %cst_13 [0] : vector<2x8x128xf32> to vector<8x128xf32>
    %51 = arith.addf %3, %50 : vector<8x128xf32>
    %c1_i32 = arith.constant 1 : i32
    %c0_14 = arith.constant 0 : index
    %c0_15 = arith.constant 0 : index
    %52 = vector.load %arg5[%c0_14, %c0_15] : memref<40x128xf32, #tpu.memory_space<vmem>>, vector<40x128xf32>
    %53 = tpu.concatenate %38, %41, %44, %48, %51 in 0 : vector<8x128xf32>, vector<8x128xf32>, vector<8x128xf32>, vector<8x128xf32>, vector<8x128xf32> -> vector<40x128xf32>
    %54 = arith.addf %52, %53 : vector<40x128xf32>
    %c0_16 = arith.constant 0 : index
    %c0_17 = arith.constant 0 : index
    %55 = vector.load %arg5[%c0_16, %c0_17] : memref<40x128xf32, #tpu.memory_space<vmem>>, vector<40x128xf32>
    tpu.vector_store %arg5[%c0_16, %c0_17], %54 {strides = array<i32>} : memref<40x128xf32, #tpu.memory_space<vmem>>, vector<40x128xf32>,
    return
  }
  func.func @transform_0(%arg0: i32, %arg1: i32) -> (i32, i32) {
    %c1_i32 = arith.constant 1 : i32
    %0 = arith.muli %arg0, %c1_i32 : i32
    %1 = arith.addi %0, %arg1 : i32
    %c0_i32 = arith.constant 0 : i32
    %c0_i32_0 = arith.constant 0 : i32
    return %1, %c0_i32 : i32, i32
  }
  func.func @transform_1(%arg0: i32, %arg1: i32) -> (i32, i32) {
    %c1_i32 = arith.constant 1 : i32
    %0 = arith.muli %arg0, %c1_i32 : i32
    %1 = arith.addi %0, %arg1 : i32
    %c0_i32 = arith.constant 0 : i32
    %c0_i32_0 = arith.constant 0 : i32
    return %1, %c0_i32 : i32, i32
  }
  func.func @transform_2(%arg0: i32, %arg1: i32) -> (i32, i32) {
    %c1_i32 = arith.constant 1 : i32
    %0 = arith.muli %arg0, %c1_i32 : i32
    %1 = arith.addi %0, %arg1 : i32
    %c0_i32 = arith.constant 0 : i32
    %c0_i32_0 = arith.constant 0 : i32
    return %1, %c0_i32 : i32, i32
  }
  func.func @transform_3(%arg0: i32, %arg1: i32) -> (i32, i32) {
    %c0_i32 = arith.constant 0 : i32
    %c0_i32_0 = arith.constant 0 : i32
    return %arg0, %c0_i32 : i32, i32
  }
}

</mosaic_0001>

<bundles_post_ra>
// kernel: tpu_custom_call.1
= control target key start
LH: loop header
LB: loop body
LE: loop exit
PB: predicated region body
PF: predicated region fallthrough
CT: control target
= control target key end

     0   :  { %8 = vsyncpa [#allocation3], 0  ;;  %s358_s0 = inlined_call_operand.hbm [shape: f32[16,128], index: 0, kind: input, shape index: {}]   ;;  %s359_s1 = inlined_call_operand.hbm [shape: f32[16,128], index: 1, kind: input, shape index: {}]   ;;  %s360_s2 = inlined_call_operand.hbm [shape: f32[16,128], index: 2, kind: input, shape index: {}]   ;;  %s361_s3 = inlined_call_operand.hbm [shape: f32[40,128], index: 3, kind: output, shape index: {}]  }
   0x1   :  { %9 = vsyncpa [#allocation6], 0 }
   0x2   :  { %10 = vsyncpa [#allocation4], 0  ;;  %s295_s12 = smov [#allocation5]   ;;  %s296_s14 = smov [#allocation2]  }
   0x3   :  { %s36_s13 = sshll.u32 %s295_s12, 4  ;;  %s20_s15 = sshll.u32 %s296_s14, 4  ;;  %s37_s13 = int_to_ptr.vmem [resolvable:$true] %s36_s13  ;;  %s21_s15 = int_to_ptr.vmem [resolvable:$true] %s20_s15 }
   0x4   :  { %s217_s16 = scalar_lea.vmem %s37_s13, 256  ;;  %p222_p1 = scmp.lt.s32.totalorder %s37_s13, %s37_s13 }
   0x5   :  { %p218_p0 = scmp.ne.s32.totalorder %s37_s13, %s217_s16  ;;  %p223_p2 = scmp.lt.s32.totalorder %s217_s16, %s217_s16 }
   0x7   :  { %p224_p3 = por %p223_p2, %p222_p1 }
   0x9   :  { %p225_p4 = pnand %p224_p3, %p218_p0 }
   0xb   :  { %228 = shalt.err (!%p225_p4)
}
   0xc   :  { %s297_s17 = smov 128   ;;  %s298_s18 = smov 8  }
   0xd   :  { %42 = dma.hbm_to_vmem [thread:$0]  %s359_s1, 256, %s37_s13, [#allocation6], %s297_s17, %s297_s17, %s298_s18  }
   0xe   :  { %s237_s21 = scalar_lea.vmem %s21_s15, 256  ;;  %p242_p6 = scmp.lt.s32.totalorder %s21_s15, %s21_s15 }
   0xf   :  { %p238_p5 = scmp.ne.s32.totalorder %s21_s15, %s237_s21  ;;  %p243_p7 = scmp.lt.s32.totalorder %s237_s21, %s237_s21 }
  0x11   :  { %p244_p8 = por %p243_p7, %p242_p6 }
  0x13   :  { %p245_p9 = pnand %p244_p8, %p238_p5 }
  0x15   :  { %248 = shalt.err (!%p245_p9)
}
  0x16   :  { %26 = dma.hbm_to_vmem [thread:$0]  %s358_s0, 256, %s21_s15, [#allocation3], %s297_s17, %s297_s17, %s298_s18  }
  0x17   :  { %s299_s24 = smov [#allocation7]  }
  0x18   :  { %s52_s25 = sshll.u32 %s299_s24, 4  ;;  %s53_s25 = int_to_ptr.vmem [resolvable:$true] %s52_s25 }
  0x19   :  { %s257_s26 = scalar_lea.vmem %s53_s25, 256  ;;  %p262_p11 = scmp.lt.s32.totalorder %s53_s25, %s53_s25 }
  0x1a   :  { %p258_p10 = scmp.ne.s32.totalorder %s53_s25, %s257_s26  ;;  %p263_p12 = scmp.lt.s32.totalorder %s257_s26, %s257_s26 }
  0x1c   :  { %p264_p13 = por %p263_p12, %p262_p11 }
  0x1e   :  { %p265_p0 = pnand %p264_p13, %p258_p10 }
  0x20   :  { %268 = shalt.err (!%p265_p0)
}
  0x21   :  { %58 = dma.hbm_to_vmem [thread:$0]  %s360_s2, 256, %s53_s25, [#allocation6], %s297_s17, %s297_s17, %s298_s18  }
  0x22   :  { %289 = dma.done.wait [#allocation3], 256  }
  0x23   :  { %290 = vsyncadd [#allocation3], 4294967040 }
  0x24   :  { %291 = dma.done.wait [#allocation6], 512  }
  0x25   :  { %292 = vsyncadd [#allocation6], 4294966784  ;;  %v83_v0 = vld [vmem:[#allocation2] sm:$0xff]  ;;  %v84_v1 = vld [vmem:[#allocation2 + $0x8] sm:$0xff]  ;;  %s300_s0 = smov [#allocation8]  }
  0x26   :  { %v85_v2 = vld [vmem:[#allocation5] sm:$0xff]  ;;  %v86_v3 = vld [vmem:[#allocation5 + $0x8] sm:$0xff]  ;;  %v89_v4 = vand.u32 2147483647, %v83_v0  ;;  %v90_v5 = vand.u32 2147483647, %v84_v1 }
  0x27   :  { %v149_v6 = vadd.f32 %v86_v3, %v85_v2  ;;  %v107_v20 = vmax.f32 %v83_v0, 0.0  ;;  %v109_v21 = vmul.f32 %v85_v2, %v83_v0  ;;  %vm101_vm0 = vcmp.ge.f32.partialorder %v83_v0, 0.0  ;;  %v87_v26 = vld [vmem:[#allocation7] sm:$0xff]  ;;  %v88_v31 = vld [vmem:[#allocation7 + $0x8] sm:$0xff]  ;;  %s177_s2 = sshll.u32 %s300_s0, 4  ;;  %s178_s2 = int_to_ptr.vmem [resolvable:$true] %s177_s2 }
  0x28   :  { %v91_v7 = vsub.f32 0.0, %v89_v4  ;;  %v92_v8 = vsub.f32 0.0, %v90_v5  ;;  %vm102_vm1 = vcmp.ge.f32.partialorder %v84_v1, 0.0  ;;  %v108_v27 = vmax.f32 %v84_v1, 0.0  ;;  %s269_s28 = scalar_lea.vmem %s178_s2, 640  ;;  %p274_p2 = scmp.lt.s32.totalorder %s178_s2, %s178_s2 }
  0x29   :  { %169 = vst [vmem:[#allocation8 + $0x10] sm:$0xff] %v149_v6  ;;  %v110_v32 = vmul.f32 %v86_v3, %v84_v1  ;;  %v111_v37 = vsub.f32 %v107_v20, %v109_v21  ;;  %p270_p1 = scmp.ne.s32.totalorder %s178_s2, %s269_s28  ;;  %p275_p3 = scmp.lt.s32.totalorder %s269_s28, %s269_s28 }
  0x2a   :  { %v93_v9 = vmul.f32 1.442695, %v91_v7  ;;  %v95_v10 = vmul.f32 1.442695, %v92_v8 }
  0x2b   :  { %v112_v49 = vsub.f32 %v108_v27, %v110_v32  ;;  %p276_p4 = por %p275_p3, %p274_p2 }
  0x2c   :  { %197 = vpow2.f32 %v93_v9 }
  0x2d   :  { %199 = vpow2.f32 %v95_v10  ;;  %p277_p5 = pnand %p276_p4, %p270_p1 }
  0x39   :  { %v198_v11 = vpop.eup %197 }
  0x3a   :  { %v200_v12 = vpop.eup %199  ;;  %v97_v13 = vadd.f32 1.0, %v198_v11  ;;  %v116_v15 = vmul.f32 -0.5, %v198_v11  ;;  %v119_v18 = vand.u32 2147483647, %v198_v11 }
  0x3b   :  { %v98_v14 = vadd.f32 1.0, %v200_v12  ;;  %v125_v16 = vmul.f32 -0.5, %v200_v12  ;;  %v128_v22 = vand.u32 2147483647, %v200_v12 }
  0x3c   :  { %201 = vrcp.f32 %v97_v13  ;;  %v117_v17 = vadd.f32 1.0, %v116_v15  ;;  %vm339_vm2 = vcmp.lt.f32.partialorder %v119_v18, 0.0004427343 }
  0x3d   :  { %203 = vrcp.f32 %v98_v14  ;;  %v126_v19 = vadd.f32 1.0, %v125_v16  ;;  %vm343_vm3 = vcmp.lt.f32.partialorder %v128_v22, 0.0004427343 }
  0x3e   :  { %205 = vlog2.f32 %v97_v13  ;;  %v118_v28 = vmul.f32 %v198_v11, %v117_v17 }
  0x3f   :  { %207 = vlog2.f32 %v98_v14  ;;  %v127_v34 = vmul.f32 %v200_v12, %v126_v19 }
  0x49   :  { %v202_v23 = vpop.eup %201 }
  0x4a   :  { %v204_v24 = vpop.eup %203  ;;  %v103_v25 = vmul.f32 %v202_v23, %v198_v11 }
  0x4b   :  { %v206_v29 = vpop.eup %205  ;;  %v104_v30 = vmul.f32 %v204_v24, %v200_v12 }
  0x4c   :  { %v208_v35 = vpop.eup %207  ;;  %v105_v36 = vsel %vm101_vm0, %v202_v23, %v103_v25  ;;  %v115_v38 = vmul.f32 0.6931472, %v206_v29 }
  0x4d   :  { %v106_v40 = vsel %vm102_vm1, %v204_v24, %v104_v30  ;;  %v133_v41 = vmul.f32 %v105_v36, %v85_v2  ;;  %v151_v42 = vmul.f32 %v105_v36, %v87_v26  ;;  %v124_v43 = vmul.f32 0.6931472, %v208_v35 }
  0x4e   :  { %v134_v44 = vmul.f32 %v106_v40, %v86_v3  ;;  %v147_v45 = vadd.f32 %v106_v40, %v105_v36  ;;  %v152_v46 = vmul.f32 %v106_v40, %v88_v31  ;;  %v121_v47 = vsel %vm339_vm2, %v118_v28, %v115_v38 }
  0x4f   :  { %v137_v48 = vmul.f32 2.0, %v133_v41  ;;  %v130_v50 = vsel %vm343_vm3, %v127_v34, %v124_v43  ;;  %v135_v51 = vadd.f32 %v105_v36, %v85_v2  ;;  %v131_v55 = vadd.f32 %v121_v47, %v111_v37 }
  0x50   :  { %v138_v52 = vmul.f32 2.0, %v134_v44  ;;  %v145_v53 = vadd.f32 %v134_v44, %v133_v41  ;;  %v153_v54 = vadd.f32 %v152_v46, %v151_v42  ;;  %v136_v56 = vadd.f32 %v106_v40, %v86_v3  ;;  %168 = vst [vmem:[#allocation8 + $0x8] sm:$0xff] %v147_v45 }
  0x51   :  { %v139_v57 = vsub.f32 %v135_v51, %v137_v48  ;;  %v132_v58 = vadd.f32 %v130_v50, %v112_v49 }
  0x52   :  { %v140_v59 = vsub.f32 %v136_v56, %v138_v52  ;;  %167 = vst [vmem:[#allocation8] sm:$0xff] %v145_v53  ;;  %170 = vst [vmem:[#allocation8 + $0x18] sm:$0xff] %v153_v54 }
  0x53   :  { %v141_v60 = vmul.f32 %v139_v57, %v139_v57 }
  0x54   :  { %v142_v61 = vmul.f32 %v140_v59, %v140_v59 }
  0x55   :  { %v143_v62 = vmul.f32 %v141_v60, %v131_v55 }
  0x56   :  { %v144_v63 = vmul.f32 %v142_v61, %v132_v58 }
  0x58   :  { %v155_v0 = vadd.f32 %v144_v63, %v143_v62 }
  0x5a   :  { %171 = vst [vmem:[#allocation8 + $0x20] sm:$0xff] %v155_v0 }
  0x5b   :  { %280 = shalt.err (!%p277_p5)
}
  0x5c   :  { %183 = dma.vmem_to_hbm [thread:$0]  %s178_s2, 640, %s361_s3, [#allocation4], %s297_s17, %s297_s17, %s298_s18  }
  0x5d   :  { %293 = dma.done.wait [#allocation4], 640  }
  0x5e   :  { %294 = vsyncadd [#allocation4], 4294966656 }
  0x5f   :  { %187 = vsyncpa [#allocation3], 1 }
  0x60   :  { %188 = vsyncpa [#allocation6], 1 }
  0x61   :  { %189 = vsyncpa [#allocation4], 1 }

</bundles_post_ra>
